<compile_context>
chip_gen: v6e
topology: v6e:2x2x1
jax: 0.10.0
libtpu: 0.0.40
codegen_flags: <defaults>
</compile_context>

<pallas_src>
import functools

import jax
import jax.numpy as jnp
import numpy as np
from jax.experimental import pallas as pl
from jax.experimental.pallas import tpu as pltpu


def _layernorm(v, g, b, eps=1e-5):
    mu = jnp.mean(v, axis=-1, keepdims=True)
    var = jnp.mean((v - mu) ** 2, axis=-1, keepdims=True)
    return (v - mu) * jax.lax.rsqrt(var + eps) * g + b


# --------------- kernel 1: LN1 + fused QKV projection (row-tiled) -----------
def ln_qkv_kernel(x_ref, g_ref, b_ref, wqkv_ref, bqkv_ref, qkv_ref):
    xn = _layernorm(x_ref[...], g_ref[...], b_ref[...])            # (tr, D) f32
    qkv = jnp.dot(xn.astype(jnp.bfloat16), wqkv_ref[...],
                  preferred_element_type=jnp.float32) + bqkv_ref[...]
    qkv_ref[...] = qkv.astype(qkv_ref.dtype)                       # bf16 out


# --------------- kernel 2: multi-head attention core (per batch) ------------
def attention_kernel(qkv_ref, maskadd_ref, ctx_ref, *, n_head):
    qkv = qkv_ref[0]                       # (S, 3D) bf16, Q already * 1/sqrt(hd)
    S, three_d = qkv.shape
    D = three_d // 3
    hd = D // n_head

    q = qkv[:, :D]                         # lane-aligned column slices
    k = qkv[:, D:2 * D]
    v = qkv[:, 2 * D:]

    # (S, D) -> head-batched operands with 2-D transposes + free leading-dim
    # reshapes (one relayout per tensor instead of H small slice/stack copies).
    kh = k.T.reshape(n_head, hd, S)                    # (H, hd, S)  for scores
    qh = q.T.reshape(n_head, hd, S).swapaxes(1, 2)     # (H, S, hd)
    vh = v.T.reshape(n_head, hd, S).swapaxes(1, 2)     # (H, S, hd)

    # scores for all heads: plain batched matmul, no per-head K^T in the dot
    s = jnp.einsum("hqd,hdk->hqk", qh, kh,
                   preferred_element_type=jnp.float32)             # (H, S, S)

    # additive mask ({0, -1e9}); numerically-stable softmax in f32
    s = s + maskadd_ref[...]                                       # (1,1,S) bcast
    s = s - jnp.max(s, axis=-1, keepdims=True)
    p = jnp.exp(s)
    p = p * pl.reciprocal(jnp.sum(p, axis=-1, keepdims=True), approx=True)

    ctx = jnp.einsum("hqk,hkd->hqd", p.astype(jnp.bfloat16), vh,
                     preferred_element_type=jnp.float32)           # (H, S, hd)
    # merge heads back to (S, D): batched minor transpose + free merge + 2-D T
    merged = ctx.astype(jnp.bfloat16).swapaxes(1, 2).reshape(D, S).T
    ctx_ref[0] = merged.astype(ctx_ref.dtype)


# ------- kernel 3: output proj + residual + LN2 + FFN + residual (row-tiled) -
def out_ffn_kernel(ctx_ref, x_ref, wo_ref, bo_ref, g2_ref, beta2_ref,
                   w1_ref, b1_ref, w2_ref, b2_ref, o_ref):
    attn_out = jnp.dot(ctx_ref[...], wo_ref[...],
                       preferred_element_type=jnp.float32) + bo_ref[...]
    x1 = x_ref[...] + attn_out                     # dropout == identity (eval)
    xn2 = _layernorm(x1, g2_ref[...], beta2_ref[...])
    h1 = jnp.maximum(
        jnp.dot(xn2.astype(jnp.bfloat16), w1_ref[...],
                preferred_element_type=jnp.float32) + b1_ref[...], 0.0)
    ffn = jnp.dot(h1.astype(jnp.bfloat16), w2_ref[...],
                  preferred_element_type=jnp.float32) + b2_ref[...]
    o_ref[...] = x1 + ffn


# ----------------------------- wrapper helpers ------------------------------
def _vmem_limit_bytes():
    """Generation-dependent VMEM cap: use most of 128 MiB parts (v5e/v6e),
    leave DMA headroom on v7x (64 MiB physical). Safe fallback: 32 MiB."""
    try:
        cap = int(pltpu.get_tpu_info().vmem_capacity_bytes)
    except Exception:
        return 32 * 1024 * 1024
    if cap >= 96 * 1024 * 1024:
        return 100 * 1024 * 1024
    return max(cap - 24 * 1024 * 1024, 32 * 1024 * 1024)


def _const_spec(shape, buffered):
    """BlockSpec for a constant-index (weight/bias) block. With buffered=True
    we request a single buffer (fetched once, no double-buffer VMEM cost)."""
    index_map = lambda i: tuple(0 for _ in shape)
    if buffered:
        return pl.BlockSpec(shape, index_map, pipeline_mode=pl.Buffered(1))
    return pl.BlockSpec(shape, index_map)


def prepare_params(params, n_head):
    """One-time weight preparation (hoisted out of the per-call path):
    fuse Q/K/V weights, fold 1/sqrt(hd) into the Q columns, cast matmul
    weights to bf16 once."""
    d_model = params["wq"].shape[0]
    hd = d_model // n_head
    scale = 1.0 / (hd ** 0.5)
    wqkv = jnp.concatenate(
        [params["wq"] * scale, params["wk"], params["wv"]], axis=1
    ).astype(jnp.bfloat16)
    bqkv = jnp.concatenate(
        [params["bq"] * scale, params["bk"], params["bv"]], axis=1
    ).astype(jnp.float32)
    return {
        "ln1_g": params["ln1_g"], "ln1_b": params["ln1_b"],
        "ln2_g": params["ln2_g"], "ln2_b": params["ln2_b"],
        "wqkv": wqkv, "bqkv": bqkv,
        "wo": params["wo"].astype(jnp.bfloat16), "bo": params["bo"],
        "w1": params["w1"].astype(jnp.bfloat16), "b1": params["b1"],
        "w2": params["w2"].astype(jnp.bfloat16), "b2": params["b2"],
    }


def _encoder_layer(x, src_mask, prep, n_head, *, buffered_weights):
    B, S, D = x.shape
    d_ff = prep["w1"].shape[1]
    R = B * S
    # Row tile for the flattened (B*S, D) projection / FFN grids.
    # 256 fills the 256x256 MXU M-dim on v6e/v7x; tiny inputs fall back to R.
    tr = 256 if R >= 256 else R
    n_row_tiles = pl.cdiv(R, tr)
    vmem_limit = _vmem_limit_bytes()

    x2d = x.reshape(R, D)
    maskadd = jnp.where(src_mask, jnp.float32(-1e9),
                        jnp.float32(0.0)).reshape(B, 1, S)

    row_spec = lambda width: pl.BlockSpec((tr, width), lambda i: (i, 0))

    # ---- pass 1: LN1 + fused QKV projection, row-tiled over B*S ----
    qkv2d = pl.pallas_call(
        ln_qkv_kernel,
        out_shape=jax.ShapeDtypeStruct((R, 3 * D), jnp.bfloat16),
        grid_spec=pltpu.PrefetchScalarGridSpec(
            num_scalar_prefetch=0,
            grid=(n_row_tiles,),
            in_specs=[
                row_spec(D),
                _const_spec((1, D), buffered_weights),
                _const_spec((1, D), buffered_weights),
                _const_spec((D, 3 * D), buffered_weights),
                _const_spec((1, 3 * D), buffered_weights),
            ],
            out_specs=pl.BlockSpec((tr, 3 * D), lambda i: (i, 0)),
        ),
        compiler_params=pltpu.CompilerParams(
            dimension_semantics=("parallel",),
            vmem_limit_bytes=vmem_limit,
        ),
    )(x2d, prep["ln1_g"], prep["ln1_b"], prep["wqkv"], prep["bqkv"])

    qkv = qkv2d.reshape(B, S, 3 * D)

    # ---- pass 2: per-batch multi-head attention core ----
    # TODO(synk): flash-style query tiling + online softmax for long S.
    ctx = pl.pallas_call(
        functools.partial(attention_kernel, n_head=n_head),
        out_shape=jax.ShapeDtypeStruct((B, S, D), jnp.bfloat16),
        grid_spec=pltpu.PrefetchScalarGridSpec(
            num_scalar_prefetch=0,
            grid=(B,),
            in_specs=[
                pl.BlockSpec((1, S, 3 * D), lambda b: (b, 0, 0)),
                pl.BlockSpec((1, 1, S), lambda b: (b, 0, 0)),
            ],
            out_specs=pl.BlockSpec((1, S, D), lambda b: (b, 0, 0)),
        ),
        compiler_params=pltpu.CompilerParams(
            dimension_semantics=("parallel",),
            vmem_limit_bytes=vmem_limit,
        ),
    )(qkv, maskadd)

    ctx2d = ctx.reshape(R, D)

    # ---- pass 3: output projection + residual + LN2 + FFN + residual ----
    # TODO(synk): stream w1/w2 over a d_ff grid axis for production d_ff on v7x.
    out2d = pl.pallas_call(
        out_ffn_kernel,
        out_shape=jax.ShapeDtypeStruct((R, D), jnp.float32),
        grid_spec=pltpu.PrefetchScalarGridSpec(
            num_scalar_prefetch=0,
            grid=(n_row_tiles,),
            in_specs=[
                row_spec(D),                                 # ctx (bf16)
                row_spec(D),                                 # x residual (f32)
                _const_spec((D, D), buffered_weights),       # wo
                _const_spec((1, D), buffered_weights),       # bo
                _const_spec((1, D), buffered_weights),       # ln2 gamma
                _const_spec((1, D), buffered_weights),       # ln2 beta
                _const_spec((D, d_ff), buffered_weights),    # w1
                _const_spec((1, d_ff), buffered_weights),    # b1
                _const_spec((d_ff, D), buffered_weights),    # w2
                _const_spec((1, D), buffered_weights),       # b2
            ],
            out_specs=pl.BlockSpec((tr, D), lambda i: (i, 0)),
        ),
        compiler_params=pltpu.CompilerParams(
            dimension_semantics=("parallel",),
            vmem_limit_bytes=vmem_limit,
        ),
    )(ctx2d, x2d, prep["wo"], prep["bo"], prep["ln2_g"], prep["ln2_b"],
      prep["w1"], prep["b1"], prep["w2"], prep["b2"])

    return out2d.reshape(B, S, D)


def encoder_layer(x, src_mask, prep, n_head):
    """x: (B, S, D) float32; src_mask: (B, S) bool (True = masked key)."""
    try:
        return _encoder_layer(x, src_mask, prep, n_head, buffered_weights=True)
    except Exception:
        # pipeline_mode=pl.Buffered(1) unavailable on this jax/backend combo:
        # fall back to default double-buffered constant blocks (correctness
        # identical, slightly more VMEM).
        return _encoder_layer(x, src_mask, prep, n_head, buffered_weights=False)


# ------------------------------ pure-JAX reference --------------------------
def encoder_layer_ref(x, src_mask, params, n_head):
    """Pure-JAX f32 reference mirroring the PyTorch forward."""
    B, S, D = x.shape
    hd = D // n_head

    def ln(v, g, b):
        mu = jnp.mean(v, axis=-1, keepdims=True)
        var = jnp.mean((v - mu) ** 2, axis=-1, keepdims=True)
        return (v - mu) / jnp.sqrt(var + 1e-5) * g[0] + b[0]

    xn = ln(x, params["ln1_g"], params["ln1_b"])
    Q = xn @ params["wq"] + params["bq"][0]
    K = xn @ params["wk"] + params["bk"][0]
    V = xn @ params["wv"] + params["bv"][0]
    Q = Q.reshape(B, S, n_head, hd).transpose(0, 2, 1, 3)
    K = K.reshape(B, S, n_head, hd).transpose(0, 2, 1, 3)
    V = V.reshape(B, S, n_head, hd).transpose(0, 2, 1, 3)
    s = jnp.einsum("bhqd,bhkd->bhqk", Q, K)
    m = src_mask[:, None, None, :]
    s = jnp.where(m, -1e9, s)
    p = jax.nn.softmax(s / (hd ** 0.5), axis=-1)
    ctx = jnp.einsum("bhqk,bhkd->bhqd", p, V).transpose(0, 2, 1, 3).reshape(B, S, D)
    attn_out = ctx @ params["wo"] + params["bo"][0]
    x1 = x + attn_out
    xn2 = ln(x1, params["ln2_g"], params["ln2_b"])
    ffn = jnp.maximum(xn2 @ params["w1"] + params["b1"][0], 0.0) @ params["w2"] + params["b2"][0]
    return x1 + ffn


def init_params(key, d_model, d_ff):
    ks = jax.random.split(key, 12)
    s = 0.05
    return {
        "ln1_g": jnp.ones((1, d_model), jnp.float32),
        "ln1_b": jnp.zeros((1, d_model), jnp.float32),
        "ln2_g": jnp.ones((1, d_model), jnp.float32),
        "ln2_b": jnp.zeros((1, d_model), jnp.float32),
        "wq": s * jax.random.normal(ks[0], (d_model, d_model), jnp.float32),
        "bq": s * jax.random.normal(ks[1], (1, d_model), jnp.float32),
        "wk": s * jax.random.normal(ks[2], (d_model, d_model), jnp.float32),
        "bk": s * jax.random.normal(ks[3], (1, d_model), jnp.float32),
        "wv": s * jax.random.normal(ks[4], (d_model, d_model), jnp.float32),
        "bv": s * jax.random.normal(ks[5], (1, d_model), jnp.float32),
        "wo": s * jax.random.normal(ks[6], (d_model, d_model), jnp.float32),
        "bo": s * jax.random.normal(ks[7], (1, d_model), jnp.float32),
        "w1": s * jax.random.normal(ks[8], (d_model, d_ff), jnp.float32),
        "b1": s * jax.random.normal(ks[9], (1, d_ff), jnp.float32),
        "w2": s * jax.random.normal(ks[10], (d_ff, d_model), jnp.float32),
        "b2": s * jax.random.normal(ks[11], (1, d_model), jnp.float32),
    }


if __name__ == "__main__":
    # Small but lane-dense shapes: D and d_ff are multiples of 128.
    B, S, d_model, d_ff, n_head = 2, 16, 128, 256, 4

    key = jax.random.PRNGKey(0)
    kx, km, kp = jax.random.split(key, 3)
    x = jax.random.normal(kx, (B, S, d_model), jnp.float32)
    # src_mask: True = masked-out key position (as in PyTorch masked_fill_)
    src_mask = jax.random.bernoulli(km, p=0.25, shape=(B, S))
    params = init_params(kp, d_model, d_ff)
    prep = prepare_params(params, n_head)     # one-time weight prep (hoisted)

    out = encoder_layer(x, src_mask, prep, n_head)
    out = jax.block_until_ready(out)

    ref = encoder_layer_ref(x, src_mask, params, n_head)
    # Tolerance reflects bf16 MXU matmuls / bf16 intermediates (+ approx EUP
    # reciprocal) in the kernels vs. the pure-f32 reference.
    np.testing.assert_allclose(np.asarray(out), np.asarray(ref),
                               rtol=2e-2, atol=2e-2)
    print("KERNEL_OK")
</pallas_src>

<mosaic_0001>
module attributes {stable_mosaic.version = 11 : i64} {
  func.func @ln_qkv_kernel(%arg0: i32, %arg1: memref<32x128xf32, #tpu.memory_space<vmem>>, %arg2: memref<1x128xf32, #tpu.memory_space<vmem>>, %arg3: memref<1x128xf32, #tpu.memory_space<vmem>>, %arg4: memref<128x384xbf16, #tpu.memory_space<vmem>>, %arg5: memref<1x384xf32, #tpu.memory_space<vmem>>, %arg6: memref<32x384xbf16, #tpu.memory_space<vmem>>) attributes {dimension_semantics = [#tpu.dimension_semantics<parallel>], iteration_bounds = array<i64: 1>, scalar_prefetch = 0 : i64, scratch_operands = 0 : i64, tpu.core_type = #tpu.core_type<tc>, window_params = [{transform_indices = @transform_0, window_bounds = array<i64: 32, 128>}, {pipeline_mode = #tpu.pipeline_mode<synchronous>, transform_indices = @transform_1, window_bounds = array<i64: 1, 128>}, {pipeline_mode = #tpu.pipeline_mode<synchronous>, transform_indices = @transform_2, window_bounds = array<i64: 1, 128>}, {pipeline_mode = #tpu.pipeline_mode<synchronous>, transform_indices = @transform_3, window_bounds = array<i64: 128, 384>}, {pipeline_mode = #tpu.pipeline_mode<synchronous>, transform_indices = @transform_4, window_bounds = array<i64: 1, 384>}, {transform_indices = @transform_5, window_bounds = array<i64: 32, 384>}]} {
    %c0 = arith.constant 0 : index
    %c0_0 = arith.constant 0 : index
    %0 = vector.load %arg1[%c0, %c0_0] : memref<32x128xf32, #tpu.memory_space<vmem>>, vector<32x128xf32>
    %c0_1 = arith.constant 0 : index
    %c0_2 = arith.constant 0 : index
    %1 = vector.load %arg2[%c0_1, %c0_2] : memref<1x128xf32, #tpu.memory_space<vmem>>, vector<1x128xf32>
    %c0_3 = arith.constant 0 : index
    %c0_4 = arith.constant 0 : index
    %2 = vector.load %arg3[%c0_3, %c0_4] : memref<1x128xf32, #tpu.memory_space<vmem>>, vector<1x128xf32>
    %cst = arith.constant dense<0.000000e+00> : vector<32xf32>
    %3 = vector.multi_reduction <add>, %0, %cst [1] : vector<32x128xf32> to vector<32xf32>
    %4 = vector.shape_cast %3 : vector<32xf32> to vector<32x1xf32>
    %cst_5 = arith.constant 1.280000e+02 : f32
    %5 = vector.broadcast %cst_5 : f32 to vector<32x1xf32>
    %6 = arith.divf %4, %5 : vector<32x1xf32>
    %7 = vector.broadcast %6 : vector<32x1xf32> to vector<32x128xf32>
    %8 = arith.subf %0, %7 : vector<32x128xf32>
    %9 = arith.mulf %8, %8 : vector<32x128xf32>
    %cst_6 = arith.constant dense<0.000000e+00> : vector<32xf32>
    %10 = vector.multi_reduction <add>, %9, %cst_6 [1] : vector<32x128xf32> to vector<32xf32>
    %11 = vector.shape_cast %10 : vector<32xf32> to vector<32x1xf32>
    %cst_7 = arith.constant 1.280000e+02 : f32
    %12 = vector.broadcast %cst_7 : f32 to vector<32x1xf32>
    %13 = arith.divf %11, %12 : vector<32x1xf32>
    %14 = vector.broadcast %6 : vector<32x1xf32> to vector<32x128xf32>
    %15 = arith.subf %0, %14 : vector<32x128xf32>
    %cst_8 = arith.constant 9.99999974E-6 : f32
    %16 = vector.broadcast %cst_8 : f32 to vector<32x1xf32>
    %17 = arith.addf %13, %16 : vector<32x1xf32>
    %18 = math.rsqrt %17 : vector<32x1xf32>
    %19 = vector.broadcast %18 : vector<32x1xf32> to vector<32x128xf32>
    %20 = arith.mulf %15, %19 : vector<32x128xf32>
    %21 = vector.broadcast %1 : vector<1x128xf32> to vector<32x128xf32>
    %22 = arith.mulf %20, %21 : vector<32x128xf32>
    %23 = vector.broadcast %2 : vector<1x128xf32> to vector<32x128xf32>
    %24 = arith.addf %22, %23 : vector<32x128xf32>
    %25 = arith.truncf %24 : vector<32x128xf32> to vector<32x128xbf16>
    %c0_9 = arith.constant 0 : index
    %c0_10 = arith.constant 0 : index
    %26 = vector.load %arg4[%c0_9, %c0_10] : memref<128x384xbf16, #tpu.memory_space<vmem>>, vector<128x384xbf16>
    %cst_11 = arith.constant dense<0.000000e+00> : vector<32x384xf32>
    %27 = tpu.matmul %25, %26, %cst_11 {dimension_numbers = #tpu.dot_dimension_numbers<[1], [0], [0], [1], [0, 0, 1, 1], [], []>} : vector<32x128xbf16>, vector<128x384xbf16>, vector<32x384xf32> -> vector<32x384xf32>
    %c0_12 = arith.constant 0 : index
    %c0_13 = arith.constant 0 : index
    %28 = vector.load %arg5[%c0_12, %c0_13] : memref<1x384xf32, #tpu.memory_space<vmem>>, vector<1x384xf32>
    %29 = vector.broadcast %28 : vector<1x384xf32> to vector<32x384xf32>
    %30 = arith.addf %27, %29 : vector<32x384xf32>
    %31 = arith.truncf %30 : vector<32x384xf32> to vector<32x384xbf16>
    %c0_14 = arith.constant 0 : index
    %c0_15 = arith.constant 0 : index
    %32 = vector.load %arg6[%c0_14, %c0_15] : memref<32x384xbf16, #tpu.memory_space<vmem>>, vector<32x384xbf16>
    tpu.vector_store %arg6[%c0_14, %c0_15], %31 {strides = array<i32>} : memref<32x384xbf16, #tpu.memory_space<vmem>>, vector<32x384xbf16>,
    return
  }
  func.func @transform_0(%arg0: i32) -> (i32, i32) {
    %c0_i32 = arith.constant 0 : i32
    %c0_i32_0 = arith.constant 0 : i32
    return %arg0, %c0_i32 : i32, i32
  }
  func.func @transform_1(%arg0: i32) -> (i32, i32) {
    %c0_i32 = arith.constant 0 : i32
    %c0_i32_0 = arith.constant 0 : i32
    %c0_i32_1 = arith.constant 0 : i32
    return %c0_i32, %c0_i32_0 : i32, i32
  }
  func.func @transform_2(%arg0: i32) -> (i32, i32) {
    %c0_i32 = arith.constant 0 : i32
    %c0_i32_0 = arith.constant 0 : i32
    %c0_i32_1 = arith.constant 0 : i32
    return %c0_i32, %c0_i32_0 : i32, i32
  }
  func.func @transform_3(%arg0: i32) -> (i32, i32) {
    %c0_i32 = arith.constant 0 : i32
    %c0_i32_0 = arith.constant 0 : i32
    %c0_i32_1 = arith.constant 0 : i32
    return %c0_i32, %c0_i32_0 : i32, i32
  }
  func.func @transform_4(%arg0: i32) -> (i32, i32) {
    %c0_i32 = arith.constant 0 : i32
    %c0_i32_0 = arith.constant 0 : i32
    %c0_i32_1 = arith.constant 0 : i32
    return %c0_i32, %c0_i32_0 : i32, i32
  }
  func.func @transform_5(%arg0: i32) -> (i32, i32) {
    %c0_i32 = arith.constant 0 : i32
    %c0_i32_0 = arith.constant 0 : i32
    return %arg0, %c0_i32 : i32, i32
  }
}

module attributes {stable_mosaic.version = 11 : i64} {
  func.func @ln_qkv_kernel(%arg0: i32, %arg1: memref<32x128xf32, #tpu.memory_space<vmem>>, %arg2: memref<1x128xf32, #tpu.memory_space<vmem>>, %arg3: memref<1x128xf32, #tpu.memory_space<vmem>>, %arg4: memref<128x384xbf16, #tpu.memory_space<vmem>>, %arg5: memref<1x384xf32, #tpu.memory_space<vmem>>, %arg6: memref<32x384xbf16, #tpu.memory_space<vmem>>) attributes {dimension_semantics = [#tpu.dimension_semantics<parallel>], iteration_bounds = array<i64: 1>, scalar_prefetch = 0 : i64, scratch_operands = 0 : i64, tpu.core_type = #tpu.core_type<tc>, window_params = [{transform_indices = @transform_0, window_bounds = array<i64: 32, 128>}, {pipeline_mode = #tpu.pipeline_mode<synchronous>, transform_indices = @transform_1, window_bounds = array<i64: 1, 128>}, {pipeline_mode = #tpu.pipeline_mode<synchronous>, transform_indices = @transform_2, window_bounds = array<i64: 1, 128>}, {pipeline_mode = #tpu.pipeline_mode<synchronous>, transform_indices = @transform_3, window_bounds = array<i64: 128, 384>}, {pipeline_mode = #tpu.pipeline_mode<synchronous>, transform_indices = @transform_4, window_bounds = array<i64: 1, 384>}, {transform_indices = @transform_5, window_bounds = array<i64: 32, 384>}]} {
    %c0 = arith.constant 0 : index
    %c0_0 = arith.constant 0 : index
    %0 = vector.load %arg1[%c0, %c0_0] : memref<32x128xf32, #tpu.memory_space<vmem>>, vector<32x128xf32>
    %c0_1 = arith.constant 0 : index
    %c0_2 = arith.constant 0 : index
    %1 = vector.load %arg2[%c0_1, %c0_2] : memref<1x128xf32, #tpu.memory_space<vmem>>, vector<1x128xf32>
    %c0_3 = arith.constant 0 : index
    %c0_4 = arith.constant 0 : index
    %2 = vector.load %arg3[%c0_3, %c0_4] : memref<1x128xf32, #tpu.memory_space<vmem>>, vector<1x128xf32>
    %cst = arith.constant dense<0.000000e+00> : vector<32xf32>
    %3 = vector.multi_reduction <add>, %0, %cst [1] : vector<32x128xf32> to vector<32xf32>
    %4 = vector.shape_cast %3 : vector<32xf32> to vector<32x1xf32>
    %cst_5 = arith.constant 1.280000e+02 : f32
    %5 = vector.broadcast %cst_5 : f32 to vector<32x1xf32>
    %6 = arith.divf %4, %5 : vector<32x1xf32>
    %7 = vector.broadcast %6 : vector<32x1xf32> to vector<32x128xf32>
    %8 = arith.subf %0, %7 : vector<32x128xf32>
    %9 = arith.mulf %8, %8 : vector<32x128xf32>
    %cst_6 = arith.constant dense<0.000000e+00> : vector<32xf32>
    %10 = vector.multi_reduction <add>, %9, %cst_6 [1] : vector<32x128xf32> to vector<32xf32>
    %11 = vector.shape_cast %10 : vector<32xf32> to vector<32x1xf32>
    %cst_7 = arith.constant 1.280000e+02 : f32
    %12 = vector.broadcast %cst_7 : f32 to vector<32x1xf32>
    %13 = arith.divf %11, %12 : vector<32x1xf32>
    %14 = vector.broadcast %6 : vector<32x1xf32> to vector<32x128xf32>
    %15 = arith.subf %0, %14 : vector<32x128xf32>
    %cst_8 = arith.constant 9.99999974E-6 : f32
    %16 = vector.broadcast %cst_8 : f32 to vector<32x1xf32>
    %17 = arith.addf %13, %16 : vector<32x1xf32>
    %18 = math.rsqrt %17 : vector<32x1xf32>
    %19 = vector.broadcast %18 : vector<32x1xf32> to vector<32x128xf32>
    %20 = arith.mulf %15, %19 : vector<32x128xf32>
    %21 = vector.broadcast %1 : vector<1x128xf32> to vector<32x128xf32>
    %22 = arith.mulf %20, %21 : vector<32x128xf32>
    %23 = vector.broadcast %2 : vector<1x128xf32> to vector<32x128xf32>
    %24 = arith.addf %22, %23 : vector<32x128xf32>
    %25 = arith.truncf %24 : vector<32x128xf32> to vector<32x128xbf16>
    %c0_9 = arith.constant 0 : index
    %c0_10 = arith.constant 0 : index
    %26 = vector.load %arg4[%c0_9, %c0_10] : memref<128x384xbf16, #tpu.memory_space<vmem>>, vector<128x384xbf16>
    %cst_11 = arith.constant dense<0.000000e+00> : vector<32x384xf32>
    %27 = tpu.matmul %25, %26, %cst_11 {dimension_numbers = #tpu.dot_dimension_numbers<[1], [0], [0], [1], [0, 0, 1, 1], [], []>} : vector<32x128xbf16>, vector<128x384xbf16>, vector<32x384xf32> -> vector<32x384xf32>
    %c0_12 = arith.constant 0 : index
    %c0_13 = arith.constant 0 : index
    %28 = vector.load %arg5[%c0_12, %c0_13] : memref<1x384xf32, #tpu.memory_space<vmem>>, vector<1x384xf32>
    %29 = vector.broadcast %28 : vector<1x384xf32> to vector<32x384xf32>
    %30 = arith.addf %27, %29 : vector<32x384xf32>
    %31 = arith.truncf %30 : vector<32x384xf32> to vector<32x384xbf16>
    %c0_14 = arith.constant 0 : index
    %c0_15 = arith.constant 0 : index
    %32 = vector.load %arg6[%c0_14, %c0_15] : memref<32x384xbf16, #tpu.memory_space<vmem>>, vector<32x384xbf16>
    tpu.vector_store %arg6[%c0_14, %c0_15], %31 {strides = array<i32>} : memref<32x384xbf16, #tpu.memory_space<vmem>>, vector<32x384xbf16>,
    return
  }
  func.func @transform_0(%arg0: i32) -> (i32, i32) {
    %c0_i32 = arith.constant 0 : i32
    %c0_i32_0 = arith.constant 0 : i32
    return %arg0, %c0_i32 : i32, i32
  }
  func.func @transform_1(%arg0: i32) -> (i32, i32) {
    %c0_i32 = arith.constant 0 : i32
    %c0_i32_0 = arith.constant 0 : i32
    %c0_i32_1 = arith.constant 0 : i32
    return %c0_i32, %c0_i32_0 : i32, i32
  }
  func.func @transform_2(%arg0: i32) -> (i32, i32) {
    %c0_i32 = arith.constant 0 : i32
    %c0_i32_0 = arith.constant 0 : i32
    %c0_i32_1 = arith.constant 0 : i32
    return %c0_i32, %c0_i32_0 : i32, i32
  }
  func.func @transform_3(%arg0: i32) -> (i32, i32) {
    %c0_i32 = arith.constant 0 : i32
    %c0_i32_0 = arith.constant 0 : i32
    %c0_i32_1 = arith.constant 0 : i32
    return %c0_i32, %c0_i32_0 : i32, i32
  }
  func.func @transform_4(%arg0: i32) -> (i32, i32) {
    %c0_i32 = arith.constant 0 : i32
    %c0_i32_0 = arith.constant 0 : i32
    %c0_i32_1 = arith.constant 0 : i32
    return %c0_i32, %c0_i32_0 : i32, i32
  }
  func.func @transform_5(%arg0: i32) -> (i32, i32) {
    %c0_i32 = arith.constant 0 : i32
    %c0_i32_0 = arith.constant 0 : i32
    return %arg0, %c0_i32 : i32, i32
  }
}

</mosaic_0001>

<bundles_post_ra>
// kernel: tpu_custom_call.1
= control target key start
LH: loop header
LB: loop body
LE: loop exit
PB: predicated region body
PF: predicated region fallthrough
CT: control target
= control target key end

     0   :  { %10 = vsyncpa [#allocation3], 0  ;;  %s736_s0 = inlined_call_operand.hbm [shape: f32[32,128], index: 0, kind: input, shape index: {}]   ;;  %s737_s1 = inlined_call_operand.vmem [shape: f32[1,128], index: 1, kind: input, shape index: {}]   ;;  %s738_s2 = inlined_call_operand.vmem [shape: f32[1,128], index: 2, kind: input, shape index: {}]   ;;  %s739_s3 = inlined_call_operand.hbm [shape: bf16[128,384], index: 3, kind: input, shape index: {}]   ;;  %s740_s4 = inlined_call_operand.vmem [shape: f32[1,384], index: 4, kind: input, shape index: {}]   ;;  %s741_s5 = inlined_call_operand.hbm [shape: bf16[32,384], index: 5, kind: output, shape index: {}]  }
   0x1   :  { %11 = vsyncpa [#allocation6], 0 }
   0x2   :  { %12 = vsyncpa [#allocation4], 0  ;;  %s654_s18 = smov [#allocation2]  }
   0x3   :  { %s18_s19 = sshll.u32 %s654_s18, 4  ;;  %s19_s19 = int_to_ptr.vmem [resolvable:$true] %s18_s19 }
   0x4   :  { %s596_s20 = scalar_lea.vmem %s19_s19, 512  ;;  %p601_p1 = scmp.lt.s32.totalorder %s19_s19, %s19_s19 }
   0x5   :  { %p597_p0 = scmp.ne.s32.totalorder %s19_s19, %s596_s20  ;;  %p602_p2 = scmp.lt.s32.totalorder %s596_s20, %s596_s20 }
   0x7   :  { %p603_p3 = por %p602_p2, %p601_p1 }
   0x9   :  { %p604_p4 = pnand %p603_p3, %p597_p0 }
   0xb   :  { %607 = shalt.err (!%p604_p4)
}
   0xc   :  { %s655_s21 = smov 128   ;;  %s656_s22 = smov 8  }
   0xd   :  { %24 = dma.hbm_to_vmem [thread:$0]  %s736_s0, 512, %s19_s19, [#allocation3], %s655_s21, %s655_s21, %s656_s22  }
   0xe   :  { %s657_s25 = smov [#allocation5]  }
   0xf   :  { %s34_s26 = sshll.u32 %s657_s25, 4  ;;  %s35_s26 = int_to_ptr.vmem [resolvable:$true] %s34_s26 }
  0x10   :  { %s616_s27 = scalar_lea.vmem %s35_s26, 3072  ;;  %p621_p6 = scmp.lt.s32.totalorder %s35_s26, %s35_s26 }
  0x11   :  { %p617_p5 = scmp.ne.s32.totalorder %s35_s26, %s616_s27  ;;  %p622_p7 = scmp.lt.s32.totalorder %s616_s27, %s616_s27 }
  0x13   :  { %p623_p8 = por %p622_p7, %p621_p6 }
  0x15   :  { %p624_p9 = pnand %p623_p8, %p617_p5 }
  0x17   :  { %627 = shalt.err (!%p624_p9)
}
  0x18   :  { %s658_s28 = smov 192   ;;  %s659_s29 = smov 12  }
  0x19   :  { %40 = dma.hbm_to_vmem [thread:$0]  %s739_s3, 3072, %s35_s26, [#allocation6], %s658_s28, %s658_s28, %s659_s29  }
  0x1a   :  { %648 = dma.done.wait [#allocation3], 512  }
  0x1b   :  { %649 = vsyncadd [#allocation3], 4294966784 }
  0x1c   :  { %650 = dma.done.wait [#allocation6], 3072  }
  0x1d   :  { %651 = vsyncadd [#allocation6], 4294964224  ;;  %v50_v0 = vld [vmem:[#allocation2] sm:$0xff]  ;;  %v52_v1 = vld [vmem:[#allocation2 + $0x10] sm:$0xff]  ;;  %v660_v39 = vmov 0  }
  0x1e   :  { %v51_v2 = vld [vmem:[#allocation2 + $0x8] sm:$0xff]  ;;  %56 = vadd.xlane.f32.xlu0 %v50_v0  ;;  %60 = vadd.xlane.f32.xlu1 %v52_v1  ;;  %v53_v3 = vld [vmem:[#allocation2 + $0x18] sm:$0xff]  ;;  %v551_v22 = vld [vmem:[#allocation5 + $0x94] ss:$12 sps:$4 sm:$0xff]  }
  0x1f   :  { %v548_v4 = vld [vmem:[#allocation5 + $0xac] ss:$12 sps:$4 sm:$0xff]   ;;  %v550_v5 = vld [vmem:[#allocation5 + $0xa8] ss:$12 sps:$4 sm:$0xff]   ;;  %v553_v23 = vld [vmem:[#allocation5 + $0xb0] ss:$12 sps:$4 sm:$0xff]   ;;  %332 = vmatprep.mubr.bf16.mxu0 %v660_v39 }
  0x20   :  { %300 = vmatprep.subr.bf16.mxu0 %v548_v4  ;;  %v554_v24 = vld [vmem:[#allocation5 + $0x90] ss:$12 sps:$4 sm:$0xff]   ;;  %520 = vmatprep.subr.bf16.mxu1 %v553_v23  ;;  %v557_v26 = vld [vmem:[#allocation5 + $0x98] ss:$12 sps:$4 sm:$0xff]   ;;  %v561_v29 = vld [vmem:[#allocation5 + $0x80] ss:$12 sps:$4 sm:$0xff]  }
  0x21   :  { %301 = vmatpush1.bf16.msra.mxu0 %v550_v5  ;;  %521 = vmatpush3.bf16.msra.mxu1 %v553_v23  ;;  %v555_v25 = vld [vmem:[#allocation5 + $0x7c] ss:$12 sps:$4 sm:$0xff]   ;;  %v558_v27 = vld [vmem:[#allocation5 + $0x78] ss:$12 sps:$4 sm:$0xff]   ;;  %v562_v30 = vld [vmem:[#allocation5 + $0x60] ss:$12 sps:$4 sm:$0xff]  }
  0x22   :  { %58 = vadd.xlane.f32.xlu0 %v51_v2  ;;  %62 = vadd.xlane.f32.xlu1 %v53_v3  ;;  %v559_v28 = vld [vmem:[#allocation5 + $0x64] ss:$12 sps:$4 sm:$0xff]   ;;  %v563_v31 = vld [vmem:[#allocation5 + $0x4c] ss:$12 sps:$4 sm:$0xff]   ;;  %v565_v32 = vld [vmem:[#allocation5 + $0x68] ss:$12 sps:$4 sm:$0xff]  }
  0x23   :  { %302 = vmatprep.subr.bf16.mxu0 %v551_v22  ;;  %522 = vmatprep.subr.bf16.mxu1 %v557_v26  ;;  %v566_v33 = vld [vmem:[#allocation5 + $0x48] ss:$12 sps:$4 sm:$0xff]   ;;  %v569_v35 = vld [vmem:[#allocation5 + $0x50] ss:$12 sps:$4 sm:$0xff]   ;;  %v573_v38 = vld [vmem:[#allocation5 + $0x38] ss:$12 sps:$4 sm:$0xff]  }
  0x24   :  { %v567_v34 = vld [vmem:[#allocation5 + $0x34] ss:$12 sps:$4 sm:$0xff]   ;;  %v570_v36 = vld [vmem:[#allocation5 + $0x30] ss:$12 sps:$4 sm:$0xff]   ;;  %v574_v40 = vld [vmem:[#allocation5 + $0x18] ss:$12 sps:$4 sm:$0xff]  }
  0x25   :  { %303 = vmatpush1.bf16.msra.mxu0 %v554_v24  ;;  %523 = vmatpush3.bf16.msra.mxu1 %v557_v26  ;;  %v571_v37 = vld [vmem:[#allocation5 + $0x1c] ss:$12 sps:$4 sm:$0xff]   ;;  %v575_v41 = vld [vmem:[#allocation5 + $0x4] ss:$12 sps:$4 sm:$0xff]   ;;  %v577_v42 = vld [vmem:[#allocation5 + $0x20] ss:$12 sps:$4 sm:$0xff]  }
  0x26   :  { %304 = vmatprep.subr.bf16.mxu0 %v555_v25  ;;  %524 = vmatprep.subr.bf16.mxu1 %v561_v29  ;;  %v578_v43 = vld [vmem:[#allocation5] ss:$12 sps:$4 sm:$0xff]   ;;  %v579_v44 = vld [vmem:[#allocation5 + $0x8] ss:$12 sps:$4 sm:$0xff]  }
  0x27   :  { %v468_v59 = vld [vmem:[%s737_s1] ss:$0 sm:$0xff] }
  0x29   :  { %305 = vmatpush1.bf16.msra.mxu0 %v558_v27  ;;  %525 = vmatpush3.bf16.msra.mxu1 %v561_v29 }
  0x2a   :  { %306 = vmatprep.subr.bf16.mxu0 %v559_v28  ;;  %526 = vmatprep.subr.bf16.mxu1 %v565_v32 }
  0x2d   :  { %307 = vmatpush1.bf16.msra.mxu0 %v562_v30  ;;  %527 = vmatpush3.bf16.msra.mxu1 %v565_v32 }
  0x2e   :  { %308 = vmatprep.subr.bf16.mxu0 %v563_v31  ;;  %528 = vmatprep.subr.bf16.mxu1 %v569_v35 }
  0x31   :  { %309 = vmatpush1.bf16.msra.mxu0 %v566_v33  ;;  %529 = vmatpush3.bf16.msra.mxu1 %v569_v35 }
  0x32   :  { %310 = vmatprep.subr.bf16.mxu0 %v567_v34  ;;  %530 = vmatprep.subr.bf16.mxu1 %v573_v38 }
  0x35   :  { %311 = vmatpush1.bf16.msra.mxu0 %v570_v36  ;;  %531 = vmatpush3.bf16.msra.mxu1 %v573_v38 }
  0x36   :  { %312 = vmatprep.subr.bf16.mxu0 %v571_v37  ;;  %532 = vmatprep.subr.bf16.mxu1 %v577_v42 }
  0x39   :  { %313 = vmatpush1.bf16.msra.mxu0 %v574_v40  ;;  %533 = vmatpush3.bf16.msra.mxu1 %v577_v42 }
  0x3a   :  { %314 = vmatprep.subr.bf16.mxu0 %v575_v41  ;;  %534 = vmatprep.subr.bf16.mxu1 %v579_v44 }
  0x3d   :  { %315 = vmatpush1.bf16.msra.mxu0 %v578_v43  ;;  %535 = vmatpush3.bf16.msra.mxu1 %v579_v44 }
  0xa7   :  { %v57_v6 = vpop.xlane.xlu0 %56  ;;  %v61_v7 = vpop.xlane.xlu1 %60 }
  0xa8   :  { %v65_v8 = vmul.f32 0.0078125, %v57_v6  ;;  %v67_v9 = vmul.f32 0.0078125, %v61_v7 }
  0xaa   :  { %v701_v10 = vsub.f32 %v50_v0, %v65_v8  ;;  %v703_v11 = vsub.f32 %v52_v1, %v67_v9  ;;  %v469_v0 = vld [vmem:[%s738_s2] ss:$0 sm:$0xff] }
  0xab   :  { %v59_v12 = vpop.xlane.xlu0 %58  ;;  %v63_v13 = vpop.xlane.xlu1 %62 }
  0xac   :  { %v66_v14 = vmul.f32 0.0078125, %v59_v12  ;;  %v73_v15 = vmul.f32 %v701_v10, %v701_v10  ;;  %v68_v16 = vmul.f32 0.0078125, %v63_v13  ;;  %v75_v19 = vmul.f32 %v703_v11, %v703_v11 }
  0xae   :  { %v707_v17 = vsub.f32 %v51_v2, %v66_v14  ;;  %77 = vadd.xlane.f32.xlu0 %v73_v15  ;;  %v709_v18 = vsub.f32 %v53_v3, %v68_v16  ;;  %v157_v14 = vlaneseq }
  0xb0   :  { %v74_v20 = vmul.f32 %v707_v17, %v707_v17  ;;  %v76_v21 = vmul.f32 %v709_v18, %v709_v18  ;;  %v158_v15 = vshrl.u32 %v157_v14, 7 }
  0xb2   :  { %81 = vadd.xlane.f32.xlu0 %v75_v19  ;;  %79 = vadd.xlane.f32.xlu1 %v74_v20  ;;  %v163_v16 = vsub.s32 1, %v158_v15 }
  0xb6   :  { %83 = vadd.xlane.f32.xlu1 %v76_v21 }
 0x137   :  { %v78_v45 = vpop.xlane.xlu0 %77 }
 0x138   :  { %v85_v46 = vmul.f32 0.0078125, %v78_v45 }
 0x13a   :  { %v89_v47 = vadd.f32 1e-05, %v85_v46 }
 0x13b   :  { %v80_v48 = vpop.xlane.xlu1 %79  ;;  %v82_v49 = vpop.xlane.xlu0 %81 }
 0x13c   :  { %580 = vrsqrt.f32 %v89_v47  ;;  %v86_v50 = vmul.f32 0.0078125, %v80_v48  ;;  %v87_v51 = vmul.f32 0.0078125, %v82_v49 }
 0x13e   :  { %v90_v52 = vadd.f32 1e-05, %v86_v50  ;;  %v91_v53 = vadd.f32 1e-05, %v87_v51 }
 0x13f   :  { %v84_v54 = vpop.xlane.xlu1 %83 }
 0x140   :  { %582 = vrsqrt.f32 %v90_v52  ;;  %v88_v55 = vmul.f32 0.0078125, %v84_v54 }
 0x141   :  { %584 = vrsqrt.f32 %v91_v53 }
 0x142   :  { %v92_v56 = vadd.f32 1e-05, %v88_v55 }
 0x144   :  { %586 = vrsqrt.f32 %v92_v56 }
 0x149   :  { %v581_v57 = vpop.eup %580 }
 0x14a   :  { %v97_v58 = vmul.f32 %v581_v57, %v701_v10 }
 0x14c   :  { %v107_v63 = vmul.f32 %v468_v59, %v97_v58 }
 0x14d   :  { %v583_v60 = vpop.eup %582 }
 0x14e   :  { %v585_v61 = vpop.eup %584  ;;  %v98_v62 = vmul.f32 %v583_v60, %v707_v17  ;;  %v117_v4 = vadd.f32 %v469_v0, %v107_v63  ;;  %v155_v17 = vld [vmem:[%s740_s4] sm:$0x7]  ;;  %s661_s4 = smov [#allocation7]  }
 0x14f   :  { %v99_v1 = vmul.f32 %v585_v61, %v703_v11  ;;  %v159_v11 = vsub.s32 0, %v158_v15  ;;  %v164_v20 = vrot.slane %v155_v17, %v163_v16  ;;  %s455_s9 = sshll.u32 %s661_s4, 4  ;;  %s456_s9 = int_to_ptr.vmem [resolvable:$true] %s455_s9 }
 0x150   :  { %v108_v2 = vmul.f32 %v468_v59, %v98_v62  ;;  %s628_s10 = scalar_lea.vmem %s456_s9, 768  ;;  %p633_p11 = scmp.lt.s32.totalorder %s456_s9, %s456_s9 }
 0x151   :  { %v587_v3 = vpop.eup %586  ;;  %v109_v7 = vmul.f32 %v468_v59, %v99_v1  ;;  %v160_v19 = vrot.slane %v155_v17, %v159_v11  ;;  %p629_p10 = scmp.ne.s32.totalorder %s456_s9, %s628_s10  ;;  %p634_p12 = scmp.lt.s32.totalorder %s628_s10, %s628_s10 }
 0x152   :  { %v118_v5 = vadd.f32 %v469_v0, %v108_v2  ;;  %v100_v6 = vmul.f32 %v587_v3, %v709_v18  ;;  %v167_v18 = vsub.s32 2, %v158_v15 }
 0x153   :  { %v119_v10 = vadd.f32 %v469_v0, %v109_v7  ;;  %p635_p13 = por %p634_p12, %p633_p11 }
 0x154   :  { %v121_v8 = vpack.c.bf16 %v118_v5, %v117_v4  ;;  %v110_v9 = vmul.f32 %v468_v59, %v100_v6  ;;  %v168_v22 = vrot.slane %v155_v17, %v167_v18 }
 0x155   :  { %p636_p0 = pnand %p635_p13, %p629_p10 }
 0x156   :  { %333 = vmatmul.mubr.bf16.vlgmr.msra.gmra.mxu0 %v121_v8  ;;  %536 = vmatprep.mubr.bf16.mxu1 %v121_v8  ;;  %v120_v12 = vadd.f32 %v469_v0, %v110_v9 }
 0x157   :  { %342 = vmatprep.mubr.bf16.mxu0 %v660_v39 }
 0x158   :  { %v122_v13 = vpack.c.bf16 %v120_v12, %v119_v10 }
 0x15a   :  { %537 = vmatmul.mubr.bf16.vlgmr.msra.gmra.mxu1 %v122_v13 }
 0x15e   :  { %343 = vmatmul.mubr.bf16.gmra.mxu0 %v122_v13 }
 0x216   :  { %v334_v21 = vpop.f32.mrf.mxu0 }
 0x217   :  { %v335_v24 = vadd.f32 %v334_v21, %v160_v19 }
 0x218   :  { %v336_v23 = vpop.f32.mrf.mxu0 }
 0x219   :  { %v337_v25 = vadd.f32 %v336_v23, %v164_v20 }
 0x21a   :  { %v338_v26 = vpop.f32.mrf.mxu0  ;;  %v538_v27 = vpop.f32.mrf.mxu1 }
 0x21b   :  { %v502_v28 = vpack.c.bf16 %v337_v25, %v335_v24  ;;  %v396_v29 = vadd.f32 %v538_v27, %v168_v22  ;;  %v339_v32 = vadd.f32 %v338_v26, %v160_v19 }
 0x21c   :  { %v340_v30 = vpop.f32.mrf.mxu0  ;;  %v387_v31 = vpop.f32.mrf.mxu1 }
 0x21d   :  { %442 = vst [vmem:[#allocation7] sm:$0xff] %v502_v28  ;;  %v507_v33 = vpack.c.bf16 %v396_v29, %v396_v29  ;;  %v341_v34 = vadd.f32 %v340_v30, %v164_v20  ;;  %v388_v35 = vadd.f32 %v387_v31, %v168_v22 }
 0x21e   :  { %v344_v36 = vpop.f32.mrf.mxu0  ;;  %v539_v37 = vpop.f32.mrf.mxu1 }
 0x21f   :  { %447 = vst [vmem:[#allocation7 + $0x20] sm:$0xf] %v507_v33  ;;  %v504_v38 = vpack.c.bf16 %v341_v34, %v339_v32  ;;  %v503_v39 = vpack.c.bf16 %v388_v35, %v388_v35  ;;  %v399_v40 = vadd.f32 %v539_v37, %v168_v22  ;;  %v345_v43 = vadd.f32 %v344_v36, %v160_v19 }
 0x220   :  { %v346_v41 = vpop.f32.mrf.mxu0  ;;  %v390_v42 = vpop.f32.mrf.mxu1 }
 0x221   :  { %444 = vst [vmem:[#allocation7 + $0xc] sm:$0xff] %v504_v38  ;;  %443 = vst [vmem:[#allocation7 + $0x8] sm:$0xf] %v503_v39  ;;  %v509_v44 = vpack.c.bf16 %v399_v40, %v399_v40  ;;  %v347_v45 = vadd.f32 %v346_v41, %v164_v20  ;;  %v391_v46 = vadd.f32 %v390_v42, %v168_v22 }
 0x222   :  { %v348_v47 = vpop.f32.mrf.mxu0 }
 0x223   :  { %449 = vst [vmem:[#allocation7 + $0x2c] sm:$0xf] %v509_v44  ;;  %v506_v48 = vpack.c.bf16 %v347_v45, %v345_v43  ;;  %v505_v49 = vpack.c.bf16 %v391_v46, %v391_v46  ;;  %v349_v51 = vadd.f32 %v348_v47, %v160_v19 }
 0x224   :  { %v350_v50 = vpop.f32.mrf.mxu0 }
 0x225   :  { %446 = vst [vmem:[#allocation7 + $0x18] sm:$0xff] %v506_v48  ;;  %445 = vst [vmem:[#allocation7 + $0x14] sm:$0xf] %v505_v49  ;;  %v351_v52 = vadd.f32 %v350_v50, %v164_v20 }
 0x227   :  { %v508_v53 = vpack.c.bf16 %v351_v52, %v349_v51 }
 0x229   :  { %448 = vst [vmem:[#allocation7 + $0x24] sm:$0xff] %v508_v53 }
 0x22a   :  { %639 = shalt.err (!%p636_p0)
}
 0x22b   :  { %461 = dma.vmem_to_hbm [thread:$0]  %s456_s9, 768, %s741_s5, [#allocation4], %s658_s28, %s658_s28, %s659_s29  }
 0x22c   :  { %652 = dma.done.wait [#allocation4], 768  }
 0x22d   :  { %653 = vsyncadd [#allocation4], 4294966528 }
 0x22e   :  { %465 = vsyncpa [#allocation3], 1 }
 0x22f   :  { %466 = vsyncpa [#allocation6], 1 }
 0x230   :  { %467 = vsyncpa [#allocation4], 1 }

// kernel: tpu_custom_call.1
= control target key start
LH: loop header
LB: loop body
LE: loop exit
PB: predicated region body
PF: predicated region fallthrough
CT: control target
= control target key end

     0   :  { %10 = vsyncpa [#allocation3], 0  ;;  %s736_s0 = inlined_call_operand.hbm [shape: f32[32,128], index: 0, kind: input, shape index: {}]   ;;  %s737_s1 = inlined_call_operand.vmem [shape: f32[1,128], index: 1, kind: input, shape index: {}]   ;;  %s738_s2 = inlined_call_operand.vmem [shape: f32[1,128], index: 2, kind: input, shape index: {}]   ;;  %s739_s3 = inlined_call_operand.hbm [shape: bf16[128,384], index: 3, kind: input, shape index: {}]   ;;  %s740_s4 = inlined_call_operand.vmem [shape: f32[1,384], index: 4, kind: input, shape index: {}]   ;;  %s741_s5 = inlined_call_operand.hbm [shape: bf16[32,384], index: 5, kind: output, shape index: {}]  }
   0x1   :  { %11 = vsyncpa [#allocation6], 0 }
   0x2   :  { %12 = vsyncpa [#allocation4], 0  ;;  %s654_s18 = smov [#allocation2]  }
   0x3   :  { %s18_s19 = sshll.u32 %s654_s18, 4  ;;  %s19_s19 = int_to_ptr.vmem [resolvable:$true] %s18_s19 }
   0x4   :  { %s596_s20 = scalar_lea.vmem %s19_s19, 512  ;;  %p601_p1 = scmp.lt.s32.totalorder %s19_s19, %s19_s19 }
   0x5   :  { %p597_p0 = scmp.ne.s32.totalorder %s19_s19, %s596_s20  ;;  %p602_p2 = scmp.lt.s32.totalorder %s596_s20, %s596_s20 }
   0x7   :  { %p603_p3 = por %p602_p2, %p601_p1 }
   0x9   :  { %p604_p4 = pnand %p603_p3, %p597_p0 }
   0xb   :  { %607 = shalt.err (!%p604_p4)
}
   0xc   :  { %s655_s21 = smov 128   ;;  %s656_s22 = smov 8  }
   0xd   :  { %24 = dma.hbm_to_vmem [thread:$0]  %s736_s0, 512, %s19_s19, [#allocation3], %s655_s21, %s655_s21, %s656_s22  }
   0xe   :  { %s657_s25 = smov [#allocation5]  }
   0xf   :  { %s34_s26 = sshll.u32 %s657_s25, 4  ;;  %s35_s26 = int_to_ptr.vmem [resolvable:$true] %s34_s26 }
  0x10   :  { %s616_s27 = scalar_lea.vmem %s35_s26, 3072  ;;  %p621_p6 = scmp.lt.s32.totalorder %s35_s26, %s35_s26 }
  0x11   :  { %p617_p5 = scmp.ne.s32.totalorder %s35_s26, %s616_s27  ;;  %p622_p7 = scmp.lt.s32.totalorder %s616_s27, %s616_s27 }
  0x13   :  { %p623_p8 = por %p622_p7, %p621_p6 }
  0x15   :  { %p624_p9 = pnand %p623_p8, %p617_p5 }
  0x17   :  { %627 = shalt.err (!%p624_p9)
}
  0x18   :  { %s658_s28 = smov 192   ;;  %s659_s29 = smov 12  }
  0x19   :  { %40 = dma.hbm_to_vmem [thread:$0]  %s739_s3, 3072, %s35_s26, [#allocation6], %s658_s28, %s658_s28, %s659_s29  }
  0x1a   :  { %648 = dma.done.wait [#allocation3], 512  }
  0x1b   :  { %649 = vsyncadd [#allocation3], 4294966784 }
  0x1c   :  { %650 = dma.done.wait [#allocation6], 3072  }
  0x1d   :  { %651 = vsyncadd [#allocation6], 4294964224  ;;  %v50_v0 = vld [vmem:[#allocation2] sm:$0xff]  ;;  %v52_v1 = vld [vmem:[#allocation2 + $0x10] sm:$0xff]  ;;  %v660_v39 = vmov 0  }
  0x1e   :  { %v51_v2 = vld [vmem:[#allocation2 + $0x8] sm:$0xff]  ;;  %56 = vadd.xlane.f32.xlu0 %v50_v0  ;;  %60 = vadd.xlane.f32.xlu1 %v52_v1  ;;  %v53_v3 = vld [vmem:[#allocation2 + $0x18] sm:$0xff]  ;;  %v551_v22 = vld [vmem:[#allocation5 + $0x94] ss:$12 sps:$4 sm:$0xff]  }
  0x1f   :  { %v548_v4 = vld [vmem:[#allocation5 + $0xac] ss:$12 sps:$4 sm:$0xff]   ;;  %v550_v5 = vld [vmem:[#allocation5 + $0xa8] ss:$12 sps:$4 sm:$0xff]   ;;  %v553_v23 = vld [vmem:[#allocation5 + $0xb0] ss:$12 sps:$4 sm:$0xff]   ;;  %332 = vmatprep.mubr.bf16.mxu0 %v660_v39 }
  0x20   :  { %300 = vmatprep.subr.bf16.mxu0 %v548_v4  ;;  %v554_v24 = vld [vmem:[#allocation5 + $0x90] ss:$12 sps:$4 sm:$0xff]   ;;  %520 = vmatprep.subr.bf16.mxu1 %v553_v23  ;;  %v557_v26 = vld [vmem:[#allocation5 + $0x98] ss:$12 sps:$4 sm:$0xff]   ;;  %v561_v29 = vld [vmem:[#allocation5 + $0x80] ss:$12 sps:$4 sm:$0xff]  }
  0x21   :  { %301 = vmatpush1.bf16.msra.mxu0 %v550_v5  ;;  %521 = vmatpush3.bf16.msra.mxu1 %v553_v23  ;;  %v555_v25 = vld [vmem:[#allocation5 + $0x7c] ss:$12 sps:$4 sm:$0xff]   ;;  %v558_v27 = vld [vmem:[#allocation5 + $0x78] ss:$12 sps:$4 sm:$0xff]   ;;  %v562_v30 = vld [vmem:[#allocation5 + $0x60] ss:$12 sps:$4 sm:$0xff]  }
  0x22   :  { %58 = vadd.xlane.f32.xlu0 %v51_v2  ;;  %62 = vadd.xlane.f32.xlu1 %v53_v3  ;;  %v559_v28 = vld [vmem:[#allocation5 + $0x64] ss:$12 sps:$4 sm:$0xff]   ;;  %v563_v31 = vld [vmem:[#allocation5 + $0x4c] ss:$12 sps:$4 sm:$0xff]   ;;  %v565_v32 = vld [vmem:[#allocation5 + $0x68] ss:$12 sps:$4 sm:$0xff]  }
  0x23   :  { %302 = vmatprep.subr.bf16.mxu0 %v551_v22  ;;  %522 = vmatprep.subr.bf16.mxu1 %v557_v26  ;;  %v566_v33 = vld [vmem:[#allocation5 + $0x48] ss:$12 sps:$4 sm:$0xff]   ;;  %v569_v35 = vld [vmem:[#allocation5 + $0x50] ss:$12 sps:$4 sm:$0xff]   ;;  %v573_v38 = vld [vmem:[#allocation5 + $0x38] ss:$12 sps:$4 sm:$0xff]  }
  0x24   :  { %v567_v34 = vld [vmem:[#allocation5 + $0x34] ss:$12 sps:$4 sm:$0xff]   ;;  %v570_v36 = vld [vmem:[#allocation5 + $0x30] ss:$12 sps:$4 sm:$0xff]   ;;  %v574_v40 = vld [vmem:[#allocation5 + $0x18] ss:$12 sps:$4 sm:$0xff]  }
  0x25   :  { %303 = vmatpush1.bf16.msra.mxu0 %v554_v24  ;;  %523 = vmatpush3.bf16.msra.mxu1 %v557_v26  ;;  %v571_v37 = vld [vmem:[#allocation5 + $0x1c] ss:$12 sps:$4 sm:$0xff]   ;;  %v575_v41 = vld [vmem:[#allocation5 + $0x4] ss:$12 sps:$4 sm:$0xff]   ;;  %v577_v42 = vld [vmem:[#allocation5 + $0x20] ss:$12 sps:$4 sm:$0xff]  }
  0x26   :  { %304 = vmatprep.subr.bf16.mxu0 %v555_v25  ;;  %524 = vmatprep.subr.bf16.mxu1 %v561_v29  ;;  %v578_v43 = vld [vmem:[#allocation5] ss:$12 sps:$4 sm:$0xff]   ;;  %v579_v44 = vld [vmem:[#allocation5 + $0x8] ss:$12 sps:$4 sm:$0xff]  }
  0x27   :  { %v468_v59 = vld [vmem:[%s737_s1] ss:$0 sm:$0xff] }
  0x29   :  { %305 = vmatpush1.bf16.msra.mxu0 %v558_v27  ;;  %525 = vmatpush3.bf16.msra.mxu1 %v561_v29 }
  0x2a   :  { %306 = vmatprep.subr.bf16.mxu0 %v559_v28  ;;  %526 = vmatprep.subr.bf16.mxu1 %v565_v32 }
  0x2d   :  { %307 = vmatpush1.bf16.msra.mxu0 %v562_v30  ;;  %527 = vmatpush3.bf16.msra.mxu1 %v565_v32 }
  0x2e   :  { %308 = vmatprep.subr.bf16.mxu0 %v563_v31  ;;  %528 = vmatprep.subr.bf16.mxu1 %v569_v35 }
  0x31   :  { %309 = vmatpush1.bf16.msra.mxu0 %v566_v33  ;;  %529 = vmatpush3.bf16.msra.mxu1 %v569_v35 }
  0x32   :  { %310 = vmatprep.subr.bf16.mxu0 %v567_v34  ;;  %530 = vmatprep.subr.bf16.mxu1 %v573_v38 }
  0x35   :  { %311 = vmatpush1.bf16.msra.mxu0 %v570_v36  ;;  %531 = vmatpush3.bf16.msra.mxu1 %v573_v38 }
  0x36   :  { %312 = vmatprep.subr.bf16.mxu0 %v571_v37  ;;  %532 = vmatprep.subr.bf16.mxu1 %v577_v42 }
  0x39   :  { %313 = vmatpush1.bf16.msra.mxu0 %v574_v40  ;;  %533 = vmatpush3.bf16.msra.mxu1 %v577_v42 }
  0x3a   :  { %314 = vmatprep.subr.bf16.mxu0 %v575_v41  ;;  %534 = vmatprep.subr.bf16.mxu1 %v579_v44 }
  0x3d   :  { %315 = vmatpush1.bf16.msra.mxu0 %v578_v43  ;;  %535 = vmatpush3.bf16.msra.mxu1 %v579_v44 }
  0xa7   :  { %v57_v6 = vpop.xlane.xlu0 %56  ;;  %v61_v7 = vpop.xlane.xlu1 %60 }
  0xa8   :  { %v65_v8 = vmul.f32 0.0078125, %v57_v6  ;;  %v67_v9 = vmul.f32 0.0078125, %v61_v7 }
  0xaa   :  { %v701_v10 = vsub.f32 %v50_v0, %v65_v8  ;;  %v703_v11 = vsub.f32 %v52_v1, %v67_v9  ;;  %v469_v0 = vld [vmem:[%s738_s2] ss:$0 sm:$0xff] }
  0xab   :  { %v59_v12 = vpop.xlane.xlu0 %58  ;;  %v63_v13 = vpop.xlane.xlu1 %62 }
  0xac   :  { %v66_v14 = vmul.f32 0.0078125, %v59_v12  ;;  %v73_v15 = vmul.f32 %v701_v10, %v701_v10  ;;  %v68_v16 = vmul.f32 0.0078125, %v63_v13  ;;  %v75_v19 = vmul.f32 %v703_v11, %v703_v11 }
  0xae   :  { %v707_v17 = vsub.f32 %v51_v2, %v66_v14  ;;  %77 = vadd.xlane.f32.xlu0 %v73_v15  ;;  %v709_v18 = vsub.f32 %v53_v3, %v68_v16  ;;  %v157_v14 = vlaneseq }
  0xb0   :  { %v74_v20 = vmul.f32 %v707_v17, %v707_v17  ;;  %v76_v21 = vmul.f32 %v709_v18, %v709_v18  ;;  %v158_v15 = vshrl.u32 %v157_v14, 7 }
  0xb2   :  { %81 = vadd.xlane.f32.xlu0 %v75_v19  ;;  %79 = vadd.xlane.f32.xlu1 %v74_v20  ;;  %v163_v16 = vsub.s32 1, %v158_v15 }
  0xb6   :  { %83 = vadd.xlane.f32.xlu1 %v76_v21 }
 0x137   :  { %v78_v45 = vpop.xlane.xlu0 %77 }
 0x138   :  { %v85_v46 = vmul.f32 0.0078125, %v78_v45 }
 0x13a   :  { %v89_v47 = vadd.f32 1e-05, %v85_v46 }
 0x13b   :  { %v80_v48 = vpop.xlane.xlu1 %79  ;;  %v82_v49 = vpop.xlane.xlu0 %81 }
 0x13c   :  { %580 = vrsqrt.f32 %v89_v47  ;;  %v86_v50 = vmul.f32 0.0078125, %v80_v48  ;;  %v87_v51 = vmul.f32 0.0078125, %v82_v49 }
 0x13e   :  { %v90_v52 = vadd.f32 1e-05, %v86_v50  ;;  %v91_v53 = vadd.f32 1e-05, %v87_v51 }
 0x13f   :  { %v84_v54 = vpop.xlane.xlu1 %83 }
 0x140   :  { %582 = vrsqrt.f32 %v90_v52  ;;  %v88_v55 = vmul.f32 0.0078125, %v84_v54 }
 0x141   :  { %584 = vrsqrt.f32 %v91_v53 }
 0x142   :  { %v92_v56 = vadd.f32 1e-05, %v88_v55 }
 0x144   :  { %586 = vrsqrt.f32 %v92_v56 }
 0x149   :  { %v581_v57 = vpop.eup %580 }
 0x14a   :  { %v97_v58 = vmul.f32 %v581_v57, %v701_v10 }
 0x14c   :  { %v107_v63 = vmul.f32 %v468_v59, %v97_v58 }
 0x14d   :  { %v583_v60 = vpop.eup %582 }
 0x14e   :  { %v585_v61 = vpop.eup %584  ;;  %v98_v62 = vmul.f32 %v583_v60, %v707_v17  ;;  %v117_v4 = vadd.f32 %v469_v0, %v107_v63  ;;  %v155_v17 = vld [vmem:[%s740_s4] sm:$0x7]  ;;  %s661_s4 = smov [#allocation7]  }
 0x14f   :  { %v99_v1 = vmul.f32 %v585_v61, %v703_v11  ;;  %v159_v11 = vsub.s32 0, %v158_v15  ;;  %v164_v20 = vrot.slane %v155_v17, %v163_v16  ;;  %s455_s9 = sshll.u32 %s661_s4, 4  ;;  %s456_s9 = int_to_ptr.vmem [resolvable:$true] %s455_s9 }
 0x150   :  { %v108_v2 = vmul.f32 %v468_v59, %v98_v62  ;;  %s628_s10 = scalar_lea.vmem %s456_s9, 768  ;;  %p633_p11 = scmp.lt.s32.totalorder %s456_s9, %s456_s9 }
 0x151   :  { %v587_v3 = vpop.eup %586  ;;  %v109_v7 = vmul.f32 %v468_v59, %v99_v1  ;;  %v160_v19 = vrot.slane %v155_v17, %v159_v11  ;;  %p629_p10 = scmp.ne.s32.totalorder %s456_s9, %s628_s10  ;;  %p634_p12 = scmp.lt.s32.totalorder %s628_s10, %s628_s10 }
 0x152   :  { %v118_v5 = vadd.f32 %v469_v0, %v108_v2  ;;  %v100_v6 = vmul.f32 %v587_v3, %v709_v18  ;;  %v167_v18 = vsub.s32 2, %v158_v15 }
 0x153   :  { %v119_v10 = vadd.f32 %v469_v0, %v109_v7  ;;  %p635_p13 = por %p634_p12, %p633_p11 }
 0x154   :  { %v121_v8 = vpack.c.bf16 %v118_v5, %v117_v4  ;;  %v110_v9 = vmul.f32 %v468_v59, %v100_v6  ;;  %v168_v22 = vrot.slane %v155_v17, %v167_v18 }
 0x155   :  { %p636_p0 = pnand %p635_p13, %p629_p10 }
 0x156   :  { %333 = vmatmul.mubr.bf16.vlgmr.msra.gmra.mxu0 %v121_v8  ;;  %536 = vmatprep.mubr.bf16.mxu1 %v121_v8  ;;  %v120_v12 = vadd.f32 %v469_v0, %v110_v9 }
 0x157   :  { %342 = vmatprep.mubr.bf16.mxu0 %v660_v39 }
 0x158   :  { %v122_v13 = vpack.c.bf16 %v120_v12, %v119_v10 }
 0x15a   :  { %537 = vmatmul.mubr.bf16.vlgmr.msra.gmra.mxu1 %v122_v13 }
 0x15e   :  { %343 = vmatmul.mubr.bf16.gmra.mxu0 %v122_v13 }
 0x216   :  { %v334_v21 = vpop.f32.mrf.mxu0 }
 0x217   :  { %v335_v24 = vadd.f32 %v334_v21, %v160_v19 }
 0x218   :  { %v336_v23 = vpop.f32.mrf.mxu0 }
 0x219   :  { %v337_v25 = vadd.f32 %v336_v23, %v164_v20 }
 0x21a   :  { %v338_v26 = vpop.f32.mrf.mxu0  ;;  %v538_v27 = vpop.f32.mrf.mxu1 }
 0x21b   :  { %v502_v28 = vpack.c.bf16 %v337_v25, %v335_v24  ;;  %v396_v29 = vadd.f32 %v538_v27, %v168_v22  ;;  %v339_v32 = vadd.f32 %v338_v26, %v160_v19 }
 0x21c   :  { %v340_v30 = vpop.f32.mrf.mxu0  ;;  %v387_v31 = vpop.f32.mrf.mxu1 }
 0x21d   :  { %442 = vst [vmem:[#allocation7] sm:$0xff] %v502_v28  ;;  %v507_v33 = vpack.c.bf16 %v396_v29, %v396_v29  ;;  %v341_v34 = vadd.f32 %v340_v30, %v164_v20  ;;  %v388_v35 = vadd.f32 %v387_v31, %v168_v22 }
 0x21e   :  { %v344_v36 = vpop.f32.mrf.mxu0  ;;  %v539_v37 = vpop.f32.mrf.mxu1 }
 0x21f   :  { %447 = vst [vmem:[#allocation7 + $0x20] sm:$0xf] %v507_v33  ;;  %v504_v38 = vpack.c.bf16 %v341_v34, %v339_v32  ;;  %v503_v39 = vpack.c.bf16 %v388_v35, %v388_v35  ;;  %v399_v40 = vadd.f32 %v539_v37, %v168_v22  ;;  %v345_v43 = vadd.f32 %v344_v36, %v160_v19 }
 0x220   :  { %v346_v41 = vpop.f32.mrf.mxu0  ;;  %v390_v42 = vpop.f32.mrf.mxu1 }
 0x221   :  { %444 = vst [vmem:[#allocation7 + $0xc] sm:$0xff] %v504_v38  ;;  %443 = vst [vmem:[#allocation7 + $0x8] sm:$0xf] %v503_v39  ;;  %v509_v44 = vpack.c.bf16 %v399_v40, %v399_v40  ;;  %v347_v45 = vadd.f32 %v346_v41, %v164_v20  ;;  %v391_v46 = vadd.f32 %v390_v42, %v168_v22 }
 0x222   :  { %v348_v47 = vpop.f32.mrf.mxu0 }
 0x223   :  { %449 = vst [vmem:[#allocation7 + $0x2c] sm:$0xf] %v509_v44  ;;  %v506_v48 = vpack.c.bf16 %v347_v45, %v345_v43  ;;  %v505_v49 = vpack.c.bf16 %v391_v46, %v391_v46  ;;  %v349_v51 = vadd.f32 %v348_v47, %v160_v19 }
 0x224   :  { %v350_v50 = vpop.f32.mrf.mxu0 }
 0x225   :  { %446 = vst [vmem:[#allocation7 + $0x18] sm:$0xff] %v506_v48  ;;  %445 = vst [vmem:[#allocation7 + $0x14] sm:$0xf] %v505_v49  ;;  %v351_v52 = vadd.f32 %v350_v50, %v164_v20 }
 0x227   :  { %v508_v53 = vpack.c.bf16 %v351_v52, %v349_v51 }
 0x229   :  { %448 = vst [vmem:[#allocation7 + $0x24] sm:$0xff] %v508_v53 }
 0x22a   :  { %639 = shalt.err (!%p636_p0)
}
 0x22b   :  { %461 = dma.vmem_to_hbm [thread:$0]  %s456_s9, 768, %s741_s5, [#allocation4], %s658_s28, %s658_s28, %s659_s29  }
 0x22c   :  { %652 = dma.done.wait [#allocation4], 768  }
 0x22d   :  { %653 = vsyncadd [#allocation4], 4294966528 }
 0x22e   :  { %465 = vsyncpa [#allocation3], 1 }
 0x22f   :  { %466 = vsyncpa [#allocation6], 1 }
 0x230   :  { %467 = vsyncpa [#allocation4], 1 }

</bundles_post_ra>
